<compile_context>
chip_gen: v7x
topology: tpu7x:2x2x1
jax: 0.10.0
libtpu: 0.0.40
codegen_flags: <defaults>
</compile_context>

<pallas_src>
import jax
import jax.numpy as jnp
from jax.experimental import pallas as pl
from jax.experimental.pallas import tpu as pltpu


def _make_fused_kernel(c1, c2):
    """Fused Split + (two 1x1-conv backbones) + AddDict kernel. Offsets static."""

    def kernel(x_ref,
               w1_ref, b1_ref, w2_ref, b2_ref,
               wo1_ref, bo1_ref, wo2_ref, bo2_ref,
               wa1_ref, ba1_ref, wa2_ref, ba2_ref,
               out_ref, aux_ref):
        x = x_ref[0]                 # (c1 + c2, T)  lane-dense spatial tile
        x1 = x[:c1, :]               # Split(dim=1): static channel slices, no HBM copy
        x2 = x[c1:, :]

        # backbone1 / backbone2 stand-ins: 1x1 conv (channel matmul) + bias + ReLU
        h1 = jnp.maximum(
            jnp.dot(w1_ref[...], x1, preferred_element_type=jnp.float32) + b1_ref[...],
            0.0)
        h2 = jnp.maximum(
            jnp.dot(w2_ref[...], x2, preferred_element_type=jnp.float32) + b2_ref[...],
            0.0)

        # 'out' heads + AddDict fusion (sum in-register, single store per tile)
        o = (jnp.dot(wo1_ref[...], h1, preferred_element_type=jnp.float32) + bo1_ref[...]
             + jnp.dot(wo2_ref[...], h2, preferred_element_type=jnp.float32) + bo2_ref[...])
        out_ref[0] = o.astype(out_ref.dtype)

        # 'aux' heads + AddDict fusion
        a = (jnp.dot(wa1_ref[...], h1, preferred_element_type=jnp.float32) + ba1_ref[...]
             + jnp.dot(wa2_ref[...], h2, preferred_element_type=jnp.float32) + ba2_ref[...])
        aux_ref[0] = a.astype(aux_ref.dtype)

    return kernel


def _pick_spatial_tile(hw, max_tile=4096):
    """Largest multiple of 128 dividing hw and <= max_tile; else the full extent."""
    if hw % 128 != 0 or hw <= max_tile:
        return hw
    t = max_tile - (max_tile % 128)
    while t >= 128:
        if hw % t == 0:
            return t
        t -= 128
    return hw


def deeplab_double_backbone(x, params):
    """Forward pass of DeeplabDoubleBackbone. x: (N, C1+C2, H, W) NCHW float array."""
    n, c_total, h, w = x.shape
    hidden, c1 = params['w_conv1_1'].shape
    c2 = params['w_conv1_2'].shape[1]
    assert c1 + c2 == c_total, "input channels must equal in_dims1 + in_dims2"
    c_out = params['w_out_1'].shape[0]
    c_aux = params['w_aux_1'].shape[0]
    dtype = x.dtype

    hw = h * w
    t = _pick_spatial_tile(hw)
    x_flat = x.reshape(n, c_total, hw)          # lane-dense view: last dim = H*W

    def col(v):                                  # bias -> (rows, 1) so it broadcasts on lanes
        return v.reshape(-1, 1).astype(dtype)

    def wspec(shape):                            # small weights: one untiled VMEM block
        return pl.BlockSpec(shape, lambda i, s: (0, 0))

    kernel = _make_fused_kernel(c1, c2)
    grid = (n, hw // t)

    out, aux = pl.pallas_call(
        kernel,
        out_shape=(
            jax.ShapeDtypeStruct((n, c_out, hw), dtype),
            jax.ShapeDtypeStruct((n, c_aux, hw), dtype),
        ),
        grid_spec=pltpu.PrefetchScalarGridSpec(
            num_scalar_prefetch=0,
            grid=grid,
            in_specs=[
                pl.BlockSpec((1, c_total, t), lambda i, s: (i, 0, s)),
                wspec((hidden, c1)), wspec((hidden, 1)),
                wspec((hidden, c2)), wspec((hidden, 1)),
                wspec((c_out, hidden)), wspec((c_out, 1)),
                wspec((c_out, hidden)), wspec((c_out, 1)),
                wspec((c_aux, hidden)), wspec((c_aux, 1)),
                wspec((c_aux, hidden)), wspec((c_aux, 1)),
            ],
            out_specs=[
                pl.BlockSpec((1, c_out, t), lambda i, s: (i, 0, s)),
                pl.BlockSpec((1, c_aux, t), lambda i, s: (i, 0, s)),
            ],
        ),
        compiler_params=pltpu.CompilerParams(
            dimension_semantics=("parallel", "parallel"),
        ),
    )(
        x_flat,
        params['w_conv1_1'].astype(dtype), col(params['b_conv1_1']),
        params['w_conv1_2'].astype(dtype), col(params['b_conv1_2']),
        params['w_out_1'].astype(dtype), col(params['b_out_1']),
        params['w_out_2'].astype(dtype), col(params['b_out_2']),
        params['w_aux_1'].astype(dtype), col(params['b_aux_1']),
        params['w_aux_2'].astype(dtype), col(params['b_aux_2']),
    )

    return {
        'out': out.reshape(n, c_out, h, w),
        'aux': aux.reshape(n, c_aux, h, w),
    }


def deeplab_double_backbone_ref(x, params):
    """Pure-JAX reference: Split -> Parallel(backbones) -> AddDict(['out','aux'])."""
    c1 = params['w_conv1_1'].shape[1]
    x1, x2 = x[:, :c1], x[:, c1:]

    def backbone(xi, w_conv, b_conv, w_out, b_out, w_aux, b_aux):
        hf = jnp.einsum('oc,nchw->nohw', w_conv, xi) + b_conv[None, :, None, None]
        hf = jnp.maximum(hf, 0.0)
        out = jnp.einsum('oc,nchw->nohw', w_out, hf) + b_out[None, :, None, None]
        aux = jnp.einsum('oc,nchw->nohw', w_aux, hf) + b_aux[None, :, None, None]
        return out, aux

    o1, a1 = backbone(x1, params['w_conv1_1'], params['b_conv1_1'],
                      params['w_out_1'], params['b_out_1'],
                      params['w_aux_1'], params['b_aux_1'])
    o2, a2 = backbone(x2, params['w_conv1_2'], params['b_conv1_2'],
                      params['w_out_2'], params['b_out_2'],
                      params['w_aux_2'], params['b_aux_2'])
    return {'out': o1 + o2, 'aux': a1 + a2}


if __name__ == "__main__":
    key = jax.random.PRNGKey(0)
    keys = jax.random.split(key, 13)

    n, h, w = 2, 16, 16
    in_dims1, in_dims2 = 4, 3        # backbone1.conv1.in_channels / backbone2.conv1.in_channels
    hidden = 32
    c_out, c_aux = 8, 8

    x = jax.random.normal(keys[0], (n, in_dims1 + in_dims2, h, w), dtype=jnp.float32)

    def w_init(k, shape):
        return 0.1 * jax.random.normal(k, shape, dtype=jnp.float32)

    params = {
        'w_conv1_1': w_init(keys[1], (hidden, in_dims1)),
        'b_conv1_1': w_init(keys[2], (hidden,)),
        'w_conv1_2': w_init(keys[3], (hidden, in_dims2)),
        'b_conv1_2': w_init(keys[4], (hidden,)),
        'w_out_1': w_init(keys[5], (c_out, hidden)),
        'b_out_1': w_init(keys[6], (c_out,)),
        'w_out_2': w_init(keys[7], (c_out, hidden)),
        'b_out_2': w_init(keys[8], (c_out,)),
        'w_aux_1': w_init(keys[9], (c_aux, hidden)),
        'b_aux_1': w_init(keys[10], (c_aux,)),
        'w_aux_2': w_init(keys[11], (c_aux, hidden)),
        'b_aux_2': w_init(keys[12], (c_aux,)),
    }

    out = deeplab_double_backbone(x, params)
    out = jax.block_until_ready(out)

    ref = deeplab_double_backbone_ref(x, params)
    assert out['out'].shape == (n, c_out, h, w)
    assert out['aux'].shape == (n, c_aux, h, w)
    assert jnp.allclose(out['out'], ref['out'], rtol=1e-4, atol=1e-4)
    assert jnp.allclose(out['aux'], ref['aux'], rtol=1e-4, atol=1e-4)

    print("KERNEL_OK")
</pallas_src>

<mosaic_0001>
module attributes {stable_mosaic.version = 11 : i64} {
  func.func @kernel(%arg0: i32, %arg1: i32, %arg2: memref<1x7x256xf32, #tpu.memory_space<vmem>>, %arg3: memref<32x4xf32, #tpu.memory_space<vmem>>, %arg4: memref<32x1xf32, #tpu.memory_space<vmem>>, %arg5: memref<32x3xf32, #tpu.memory_space<vmem>>, %arg6: memref<32x1xf32, #tpu.memory_space<vmem>>, %arg7: memref<8x32xf32, #tpu.memory_space<vmem>>, %arg8: memref<8x1xf32, #tpu.memory_space<vmem>>, %arg9: memref<8x32xf32, #tpu.memory_space<vmem>>, %arg10: memref<8x1xf32, #tpu.memory_space<vmem>>, %arg11: memref<8x32xf32, #tpu.memory_space<vmem>>, %arg12: memref<8x1xf32, #tpu.memory_space<vmem>>, %arg13: memref<8x32xf32, #tpu.memory_space<vmem>>, %arg14: memref<8x1xf32, #tpu.memory_space<vmem>>, %arg15: memref<1x8x256xf32, #tpu.memory_space<vmem>>, %arg16: memref<1x8x256xf32, #tpu.memory_space<vmem>>) attributes {dimension_semantics = [#tpu.dimension_semantics<parallel>, #tpu.dimension_semantics<parallel>], iteration_bounds = array<i64: 2, 1>, scalar_prefetch = 0 : i64, scratch_operands = 0 : i64, tpu.core_type = #tpu.core_type<tc>, window_params = [{transform_indices = @transform_0, window_bounds = array<i64: 1, 7, 256>}, {pipeline_mode = #tpu.pipeline_mode<synchronous>, transform_indices = @transform_1, window_bounds = array<i64: 32, 4>}, {pipeline_mode = #tpu.pipeline_mode<synchronous>, transform_indices = @transform_2, window_bounds = array<i64: 32, 1>}, {pipeline_mode = #tpu.pipeline_mode<synchronous>, transform_indices = @transform_3, window_bounds = array<i64: 32, 3>}, {pipeline_mode = #tpu.pipeline_mode<synchronous>, transform_indices = @transform_4, window_bounds = array<i64: 32, 1>}, {pipeline_mode = #tpu.pipeline_mode<synchronous>, transform_indices = @transform_5, window_bounds = array<i64: 8, 32>}, {pipeline_mode = #tpu.pipeline_mode<synchronous>, transform_indices = @transform_6, window_bounds = array<i64: 8, 1>}, {pipeline_mode = #tpu.pipeline_mode<synchronous>, transform_indices = @transform_7, window_bounds = array<i64: 8, 32>}, {pipeline_mode = #tpu.pipeline_mode<synchronous>, transform_indices = @transform_8, window_bounds = array<i64: 8, 1>}, {pipeline_mode = #tpu.pipeline_mode<synchronous>, transform_indices = @transform_9, window_bounds = array<i64: 8, 32>}, {pipeline_mode = #tpu.pipeline_mode<synchronous>, transform_indices = @transform_10, window_bounds = array<i64: 8, 1>}, {pipeline_mode = #tpu.pipeline_mode<synchronous>, transform_indices = @transform_11, window_bounds = array<i64: 8, 32>}, {pipeline_mode = #tpu.pipeline_mode<synchronous>, transform_indices = @transform_12, window_bounds = array<i64: 8, 1>}, {transform_indices = @transform_13, window_bounds = array<i64: 1, 8, 256>}, {transform_indices = @transform_14, window_bounds = array<i64: 1, 8, 256>}]} {
    %c0 = arith.constant 0 : index
    %c0_0 = arith.constant 0 : index
    %c0_1 = arith.constant 0 : index
    %0 = vector.load %arg2[%c0, %c0_0, %c0_1] : memref<1x7x256xf32, #tpu.memory_space<vmem>>, vector<1x7x256xf32>
    %1 = vector.shape_cast %0 : vector<1x7x256xf32> to vector<7x256xf32>
    %2 = vector.extract_strided_slice %1 {offsets = [0, 0], sizes = [4, 256], strides = [1, 1]} : vector<7x256xf32> to vector<4x256xf32>
    %3 = vector.extract_strided_slice %1 {offsets = [4, 0], sizes = [3, 256], strides = [1, 1]} : vector<7x256xf32> to vector<3x256xf32>
    %c0_2 = arith.constant 0 : index
    %c0_3 = arith.constant 0 : index
    %4 = vector.load %arg3[%c0_2, %c0_3] : memref<32x4xf32, #tpu.memory_space<vmem>>, vector<32x4xf32>
    %cst = arith.constant dense<0.000000e+00> : vector<32x256xf32>
    %5 = tpu.matmul %4, %2, %cst {dimension_numbers = #tpu.dot_dimension_numbers<[1], [0], [0], [1], [0, 0, 1, 1], [], []>} : vector<32x4xf32>, vector<4x256xf32>, vector<32x256xf32> -> vector<32x256xf32>
    %c0_4 = arith.constant 0 : index
    %c0_5 = arith.constant 0 : index
    %6 = vector.load %arg4[%c0_4, %c0_5] : memref<32x1xf32, #tpu.memory_space<vmem>>, vector<32x1xf32>
    %7 = vector.broadcast %6 : vector<32x1xf32> to vector<32x256xf32>
    %8 = arith.addf %5, %7 : vector<32x256xf32>
    %cst_6 = arith.constant 0.000000e+00 : f32
    %9 = vector.broadcast %cst_6 : f32 to vector<32x256xf32>
    %10 = arith.maximumf %8, %9 : vector<32x256xf32>
    %c0_7 = arith.constant 0 : index
    %c0_8 = arith.constant 0 : index
    %11 = vector.load %arg5[%c0_7, %c0_8] : memref<32x3xf32, #tpu.memory_space<vmem>>, vector<32x3xf32>
    %cst_9 = arith.constant dense<0.000000e+00> : vector<32x256xf32>
    %12 = tpu.matmul %11, %3, %cst_9 {dimension_numbers = #tpu.dot_dimension_numbers<[1], [0], [0], [1], [0, 0, 1, 1], [], []>} : vector<32x3xf32>, vector<3x256xf32>, vector<32x256xf32> -> vector<32x256xf32>
    %c0_10 = arith.constant 0 : index
    %c0_11 = arith.constant 0 : index
    %13 = vector.load %arg6[%c0_10, %c0_11] : memref<32x1xf32, #tpu.memory_space<vmem>>, vector<32x1xf32>
    %14 = vector.broadcast %13 : vector<32x1xf32> to vector<32x256xf32>
    %15 = arith.addf %12, %14 : vector<32x256xf32>
    %cst_12 = arith.constant 0.000000e+00 : f32
    %16 = vector.broadcast %cst_12 : f32 to vector<32x256xf32>
    %17 = arith.maximumf %15, %16 : vector<32x256xf32>
    %c0_13 = arith.constant 0 : index
    %c0_14 = arith.constant 0 : index
    %18 = vector.load %arg7[%c0_13, %c0_14] : memref<8x32xf32, #tpu.memory_space<vmem>>, vector<8x32xf32>
    %cst_15 = arith.constant dense<0.000000e+00> : vector<8x256xf32>
    %19 = tpu.matmul %18, %10, %cst_15 {dimension_numbers = #tpu.dot_dimension_numbers<[1], [0], [0], [1], [0, 0, 1, 1], [], []>} : vector<8x32xf32>, vector<32x256xf32>, vector<8x256xf32> -> vector<8x256xf32>
    %c0_16 = arith.constant 0 : index
    %c0_17 = arith.constant 0 : index
    %20 = vector.load %arg8[%c0_16, %c0_17] : memref<8x1xf32, #tpu.memory_space<vmem>>, vector<8x1xf32>
    %21 = vector.broadcast %20 : vector<8x1xf32> to vector<8x256xf32>
    %22 = arith.addf %19, %21 : vector<8x256xf32>
    %c0_18 = arith.constant 0 : index
    %c0_19 = arith.constant 0 : index
    %23 = vector.load %arg9[%c0_18, %c0_19] : memref<8x32xf32, #tpu.memory_space<vmem>>, vector<8x32xf32>
    %cst_20 = arith.constant dense<0.000000e+00> : vector<8x256xf32>
    %24 = tpu.matmul %23, %17, %cst_20 {dimension_numbers = #tpu.dot_dimension_numbers<[1], [0], [0], [1], [0, 0, 1, 1], [], []>} : vector<8x32xf32>, vector<32x256xf32>, vector<8x256xf32> -> vector<8x256xf32>
    %25 = arith.addf %22, %24 : vector<8x256xf32>
    %c0_21 = arith.constant 0 : index
    %c0_22 = arith.constant 0 : index
    %26 = vector.load %arg10[%c0_21, %c0_22] : memref<8x1xf32, #tpu.memory_space<vmem>>, vector<8x1xf32>
    %27 = vector.broadcast %26 : vector<8x1xf32> to vector<8x256xf32>
    %28 = arith.addf %25, %27 : vector<8x256xf32>
    %c0_23 = arith.constant 0 : index
    %c0_24 = arith.constant 0 : index
    %c0_25 = arith.constant 0 : index
    %29 = vector.load %arg15[%c0_23, %c0_24, %c0_25] : memref<1x8x256xf32, #tpu.memory_space<vmem>>, vector<1x8x256xf32>
    %30 = vector.shape_cast %29 : vector<1x8x256xf32> to vector<8x256xf32>
    %31 = vector.shape_cast %28 : vector<8x256xf32> to vector<1x8x256xf32>
    tpu.vector_store %arg15[%c0_23, %c0_24, %c0_25], %31 {strides = array<i32>} : memref<1x8x256xf32, #tpu.memory_space<vmem>>, vector<1x8x256xf32>,
    %c0_26 = arith.constant 0 : index
    %c0_27 = arith.constant 0 : index
    %32 = vector.load %arg11[%c0_26, %c0_27] : memref<8x32xf32, #tpu.memory_space<vmem>>, vector<8x32xf32>
    %cst_28 = arith.constant dense<0.000000e+00> : vector<8x256xf32>
    %33 = tpu.matmul %32, %10, %cst_28 {dimension_numbers = #tpu.dot_dimension_numbers<[1], [0], [0], [1], [0, 0, 1, 1], [], []>} : vector<8x32xf32>, vector<32x256xf32>, vector<8x256xf32> -> vector<8x256xf32>
    %c0_29 = arith.constant 0 : index
    %c0_30 = arith.constant 0 : index
    %34 = vector.load %arg12[%c0_29, %c0_30] : memref<8x1xf32, #tpu.memory_space<vmem>>, vector<8x1xf32>
    %35 = vector.broadcast %34 : vector<8x1xf32> to vector<8x256xf32>
    %36 = arith.addf %33, %35 : vector<8x256xf32>
    %c0_31 = arith.constant 0 : index
    %c0_32 = arith.constant 0 : index
    %37 = vector.load %arg13[%c0_31, %c0_32] : memref<8x32xf32, #tpu.memory_space<vmem>>, vector<8x32xf32>
    %cst_33 = arith.constant dense<0.000000e+00> : vector<8x256xf32>
    %38 = tpu.matmul %37, %17, %cst_33 {dimension_numbers = #tpu.dot_dimension_numbers<[1], [0], [0], [1], [0, 0, 1, 1], [], []>} : vector<8x32xf32>, vector<32x256xf32>, vector<8x256xf32> -> vector<8x256xf32>
    %39 = arith.addf %36, %38 : vector<8x256xf32>
    %c0_34 = arith.constant 0 : index
    %c0_35 = arith.constant 0 : index
    %40 = vector.load %arg14[%c0_34, %c0_35] : memref<8x1xf32, #tpu.memory_space<vmem>>, vector<8x1xf32>
    %41 = vector.broadcast %40 : vector<8x1xf32> to vector<8x256xf32>
    %42 = arith.addf %39, %41 : vector<8x256xf32>
    %c0_36 = arith.constant 0 : index
    %c0_37 = arith.constant 0 : index
    %c0_38 = arith.constant 0 : index
    %43 = vector.load %arg16[%c0_36, %c0_37, %c0_38] : memref<1x8x256xf32, #tpu.memory_space<vmem>>, vector<1x8x256xf32>
    %44 = vector.shape_cast %43 : vector<1x8x256xf32> to vector<8x256xf32>
    %45 = vector.shape_cast %42 : vector<8x256xf32> to vector<1x8x256xf32>
    tpu.vector_store %arg16[%c0_36, %c0_37, %c0_38], %45 {strides = array<i32>} : memref<1x8x256xf32, #tpu.memory_space<vmem>>, vector<1x8x256xf32>,
    return
  }
  func.func @transform_0(%arg0: i32, %arg1: i32) -> (i32, i32, i32) {
    %c0_i32 = arith.constant 0 : i32
    %c0_i32_0 = arith.constant 0 : i32
    return %arg0, %c0_i32, %arg1 : i32, i32, i32
  }
  func.func @transform_1(%arg0: i32, %arg1: i32) -> (i32, i32) {
    %c0_i32 = arith.constant 0 : i32
    %c0_i32_0 = arith.constant 0 : i32
    %c0_i32_1 = arith.constant 0 : i32
    return %c0_i32, %c0_i32_0 : i32, i32
  }
  func.func @transform_2(%arg0: i32, %arg1: i32) -> (i32, i32) {
    %c0_i32 = arith.constant 0 : i32
    %c0_i32_0 = arith.constant 0 : i32
    %c0_i32_1 = arith.constant 0 : i32
    return %c0_i32, %c0_i32_0 : i32, i32
  }
  func.func @transform_3(%arg0: i32, %arg1: i32) -> (i32, i32) {
    %c0_i32 = arith.constant 0 : i32
    %c0_i32_0 = arith.constant 0 : i32
    %c0_i32_1 = arith.constant 0 : i32
    return %c0_i32, %c0_i32_0 : i32, i32
  }
  func.func @transform_4(%arg0: i32, %arg1: i32) -> (i32, i32) {
    %c0_i32 = arith.constant 0 : i32
    %c0_i32_0 = arith.constant 0 : i32
    %c0_i32_1 = arith.constant 0 : i32
    return %c0_i32, %c0_i32_0 : i32, i32
  }
  func.func @transform_5(%arg0: i32, %arg1: i32) -> (i32, i32) {
    %c0_i32 = arith.constant 0 : i32
    %c0_i32_0 = arith.constant 0 : i32
    %c0_i32_1 = arith.constant 0 : i32
    return %c0_i32, %c0_i32_0 : i32, i32
  }
  func.func @transform_6(%arg0: i32, %arg1: i32) -> (i32, i32) {
    %c0_i32 = arith.constant 0 : i32
    %c0_i32_0 = arith.constant 0 : i32
    %c0_i32_1 = arith.constant 0 : i32
    return %c0_i32, %c0_i32_0 : i32, i32
  }
  func.func @transform_7(%arg0: i32, %arg1: i32) -> (i32, i32) {
    %c0_i32 = arith.constant 0 : i32
    %c0_i32_0 = arith.constant 0 : i32
    %c0_i32_1 = arith.constant 0 : i32
    return %c0_i32, %c0_i32_0 : i32, i32
  }
  func.func @transform_8(%arg0: i32, %arg1: i32) -> (i32, i32) {
    %c0_i32 = arith.constant 0 : i32
    %c0_i32_0 = arith.constant 0 : i32
    %c0_i32_1 = arith.constant 0 : i32
    return %c0_i32, %c0_i32_0 : i32, i32
  }
  func.func @transform_9(%arg0: i32, %arg1: i32) -> (i32, i32) {
    %c0_i32 = arith.constant 0 : i32
    %c0_i32_0 = arith.constant 0 : i32
    %c0_i32_1 = arith.constant 0 : i32
    return %c0_i32, %c0_i32_0 : i32, i32
  }
  func.func @transform_10(%arg0: i32, %arg1: i32) -> (i32, i32) {
    %c0_i32 = arith.constant 0 : i32
    %c0_i32_0 = arith.constant 0 : i32
    %c0_i32_1 = arith.constant 0 : i32
    return %c0_i32, %c0_i32_0 : i32, i32
  }
  func.func @transform_11(%arg0: i32, %arg1: i32) -> (i32, i32) {
    %c0_i32 = arith.constant 0 : i32
    %c0_i32_0 = arith.constant 0 : i32
    %c0_i32_1 = arith.constant 0 : i32
    return %c0_i32, %c0_i32_0 : i32, i32
  }
  func.func @transform_12(%arg0: i32, %arg1: i32) -> (i32, i32) {
    %c0_i32 = arith.constant 0 : i32
    %c0_i32_0 = arith.constant 0 : i32
    %c0_i32_1 = arith.constant 0 : i32
    return %c0_i32, %c0_i32_0 : i32, i32
  }
  func.func @transform_13(%arg0: i32, %arg1: i32) -> (i32, i32, i32) {
    %c0_i32 = arith.constant 0 : i32
    %c0_i32_0 = arith.constant 0 : i32
    return %arg0, %c0_i32, %arg1 : i32, i32, i32
  }
  func.func @transform_14(%arg0: i32, %arg1: i32) -> (i32, i32, i32) {
    %c0_i32 = arith.constant 0 : i32
    %c0_i32_0 = arith.constant 0 : i32
    return %arg0, %c0_i32, %arg1 : i32, i32, i32
  }
}

</mosaic_0001>

<bundles_post_ra>
// kernel: tpu_custom_call.1
= control target key start
LH: loop header
LB: loop body
LE: loop exit
PB: predicated region body
PF: predicated region fallthrough
CT: control target
= control target key end

     0   :  { %s1861_s0 = inlined_call_operand.vmem [shape: f32[2,7,256], index: 0, kind: input, shape index: {}]   ;;  %s1862_s1 = inlined_call_operand.vmem [shape: f32[32,4], index: 1, kind: input, shape index: {}]   ;;  %s1863_s2 = inlined_call_operand.vmem [shape: f32[32,1], index: 2, kind: input, shape index: {}]   ;;  %s1864_s3 = inlined_call_operand.vmem [shape: f32[32,3], index: 3, kind: input, shape index: {}]   ;;  %s1865_s4 = inlined_call_operand.vmem [shape: f32[32,1], index: 4, kind: input, shape index: {}]   ;;  %s1866_s5 = inlined_call_operand.vmem [shape: f32[8,32], index: 5, kind: input, shape index: {}]   ;;  %s1867_s6 = inlined_call_operand.vmem [shape: f32[8,1], index: 6, kind: input, shape index: {}]   ;;  %s1868_s7 = inlined_call_operand.vmem [shape: f32[8,32], index: 7, kind: input, shape index: {}]   ;;  %s1869_s8 = inlined_call_operand.vmem [shape: f32[8,1], index: 8, kind: input, shape index: {}]   ;;  %s1870_s9 = inlined_call_operand.vmem [shape: f32[8,32], index: 9, kind: input, shape index: {}]   ;;  %s1871_s10 = inlined_call_operand.vmem [shape: f32[8,1], index: 10, kind: input, shape index: {}]   ;;  %s1872_s11 = inlined_call_operand.vmem [shape: f32[8,32], index: 11, kind: input, shape index: {}]   ;;  %s1873_s12 = inlined_call_operand.vmem [shape: f32[8,1], index: 12, kind: input, shape index: {}]   ;;  %s1874_s13 = inlined_call_operand.hbm [shape: f32[2,8,256], index: 13, kind: output, shape index: {0}]   ;;  %s1875_s14 = inlined_call_operand.hbm [shape: f32[2,8,256], index: 14, kind: output, shape index: {1}]  }
   0x1   :  { %1883 = sst [smem:[#allocation15_spill]] %s1861_s0 }
   0x2   :  { %20 = vsyncpa [#allocation3], 0 }
   0x3   :  { %22 = vsyncpa [#allocation3 + $0x1], 0 }
   0x4   :  { %23 = vsyncpa [#allocation5], 0 }
   0x5   :  { %25 = vsyncpa [#allocation5 + $0x1], 0  ;;  %s1620_s29 = smov 0   ;;  %s1622_s30 = smov 0  }
   0x6   :  { %s1624_s15 = smov 0   ;;  %s1626_s16 = smov 0  }
   0x7   :  { %s1628_s17 = smov 0   ;;  %s1630_s18 = smov 0  }
   0x8 LB: > { %1884 = sst [smem:[#allocation8_spill]] %s1519_s29  ;;  %s1289_s19 = sadd.s32 4294967295, %s1539_s18   ;;  %s1539_s18 = sphi %s1630_s18, %s31_s18   ;;  %s1535_s17 = sphi %s1628_s17, %s1900_s17   ;;  %s1531_s16 = sphi %s1626_s16, %s1899_s16   ;;  %s1527_s15 = sphi %s1624_s15, %s1898_s15   ;;  %s1523_s30 = sphi %s1622_s30, %s1902_s30   ;;  %s1519_s29 = sphi %s1620_s29, %s1901_s29  }
   0x9   : > { %1885 = sst [smem:[#allocation9_spill]] %s1527_s15  ;;  %s1290_s20 = sadd.s32 4294967294, %s1539_s18  }
   0xa   : > { %1886 = sst [smem:[#allocation10_spill]] %s1535_s17  ;;  %s43_s21 = sadd.s32 1, %s1535_s17 }
   0xb   : > { %1887 = sst [smem:[#allocation11_spill]] %s1539_s18  ;;  %s332_s22 = sadd.s32 1, %s1527_s15 }
   0xc   : > { %p45_p0 = scmp.ge.s32.totalorder %s43_s21, 2  ;;  %p342_p1 = scmp.ne.s32.totalorder %s1527_s15, %s1523_s30 }
   0xd   : > { %p343_p2 = scmp.eq.s32.totalorder %s1289_s19, 1  ;;  %p348_p3 = scmp.ne.s32.totalorder %s1523_s30, %s1519_s29 }
   0xe   : > { %s1904_s21 = smov (%p45_p0, %s43_s21), 0  ;;  %p349_p5 = scmp.eq.s32.totalorder %s1290_s20, 1 }
   0xf   : > { %1888 = sst [smem:[#allocation12_spill]] %s1904_s21  ;;  %p1660_p4 = por %p343_p2, %p342_p1 }
  0x10   : > { %s327_s24 = ssub.s32 %s1535_s17, %s1904_s21  ;;  %p1293_p6 = scmp.ge.s32.totalorder %s1539_s18, 1 }
  0x11   : > { %p330_p7 = scmp.eq.s32.totalorder %s327_s24, 0  ;;  %p1667_p8 = por %p349_p5, %p348_p3 }
  0x12   : > { %p444_p9 = scmp.lt.s32.totalorder %s1539_s18, 3 }
  0x13   : > { %s1890_s25 = scalar_select %p1667_p8, 1, 0 }
  0x14   : > { %s1673_s26 = scalar_select %p330_p7, %s1527_s15, %s332_s22  }
  0x15   : > { %1891 = sst [smem:[#allocation13_spill]] %s1890_s25  ;;  %p445_p10 = pnand %p1293_p6, %p444_p9 }
  0x16   : > { %1892 = sst [smem:[#allocation14_spill]] %s1673_s26  ;;  %p500_p11 = scmp.lt.s32.totalorder (!%p445_p10), %s1531_s16, 1  ;;  %v1541_v0 = vmov (!%p445_p10), 0.0   ;;  %v1542_v1 = vmov (!%p445_p10), 0   ;;  %v517_v2 = vld [vmem:[%s1863_s2] sm:$0xff] (!%p445_p10)  ;;  %vm554_vm0 = vcmask (!%p445_p10), 1043456  }
  0x17   : > { %448 = sbr.rel (%p445_p10) target bundleno = 534 (0x216), region = 72  ;;  %625 = vmatprep.mubr.f32.mxu0 (!%p445_p10), %v1541_v0  ;;  %770 = vmatprep.mubr.f32.mxu1 (!%p445_p10), %v1541_v0  ;;  %v519_v3 = vld [vmem:[%s1863_s2 + $0x10] sm:$0xff] (!%p445_p10)  ;;  %s1893_s0 = sld [smem:[#allocation15_spill]] (!%p445_p10)  ;;  %v513_v4 = vld [vmem:[%s1862_s1] sm:$0xff] (!%p445_p10)  ;;  %v518_v5 = vld [vmem:[%s1863_s2 + $0x8] sm:$0xff] (!%p445_p10)  ;;  %vm541_vm1 = vcmask (!%p445_p10), 31744  }
  0x18   : > { %1427 = vset.pattern.permute.xlu0 (!%p445_p10), %v1542_v1  ;;  %1428 = vset.pattern.permute.xlu1 (!%p445_p10), %v1542_v1  ;;  %vm701_vm2 = vcmask (!%p445_p10), 1042432   ;;  %v658_v10 = vld [vmem:[%s1864_s3] sm:$0xff] (!%p445_p10)  ;;  %vm688_vm3 = vcmask (!%p445_p10), 23552   ;;  %v520_v11 = vld [vmem:[%s1863_s2 + $0x18] sm:$0xff] (!%p445_p10)  ;;  %v514_v13 = vld [vmem:[%s1862_s1 + $0x8] sm:$0xff] (!%p445_p10)  ;;  %vm810_vm4 = vcmask (!%p445_p10), 261120  }
  0x19   : > { %523 = vperm.xlu0 (!%p445_p10), %1427, %v517_v2   ;;  %533 = vperm.xlu1 (!%p445_p10), %1428, %v519_v3   ;;  %v662_v12 = vld [vmem:[%s1865_s4] sm:$0xff] (!%p445_p10)  ;;  %v659_v14 = vld [vmem:[%s1864_s3 + $0x8] sm:$0xff] (!%p445_p10)  ;;  %v664_v16 = vld [vmem:[%s1865_s4 + $0x10] sm:$0xff] (!%p445_p10)  ;;  %s1777_s17 = sand.u32 (!%p445_p10), 1, %s1523_s30   ;;  %s1323_s21 = sshll.u32 (!%p445_p10), %s1531_s16, 8 }
  0x1a   : > { %v663_v15 = vld [vmem:[%s1865_s4 + $0x8] sm:$0xff] (!%p445_p10)  ;;  %v515_v17 = vld [vmem:[%s1862_s1 + $0x10] sm:$0xff] (!%p445_p10)  ;;  %v665_v19 = vld [vmem:[%s1865_s4 + $0x18] sm:$0xff] (!%p445_p10)  ;;  %s1294_s15 = sshll.u32 (!%p445_p10), %s1777_s17, 4  ;;  %s1791_s24 = scalar_lea.hbm (!%p445_p10), %s1875_s14, %s1323_s21 }
  0x1b   : > { %v660_v18 = vld [vmem:[%s1864_s3 + $0x10] sm:$0xff] (!%p445_p10)  ;;  %v804_v20 = vld [vmem:[%s1867_s6] sm:$0xff] (!%p445_p10)  ;;  %v516_v21 = vld [vmem:[%s1862_s1 + $0x18] sm:$0xff] (!%p445_p10)  ;;  %s491_s29 = scalar_lea.vmem (!%p445_p10), [#allocation2], %s1294_s15  ;;  %s498_s25 = scalar_lea.vmem (!%p445_p10), [#allocation4], %s1294_s15 }
  0x1c   : > { %v661_v22 = vld [vmem:[%s1864_s3 + $0x18] sm:$0xff] (!%p445_p10)  ;;  %v973_v23 = vld [vmem:[%s1871_s10] sm:$0xff] (!%p445_p10)  ;;  %s1162_s18 = sshll.u32 (!%p445_p10), %s491_s29, 4  ;;  %s1543_s28 = smov (!%p445_p10), [#allocation2]   ;;  %s1786_s18 = int_to_ptr.vmem [resolvable:$true] %s1162_s18 }
  0x1d   : > { %528 = vperm.xlu0 (!%p445_p10), %1427, %v518_v5   ;;  %538 = vperm.xlu1 (!%p445_p10), %1428, %v520_v11   ;;  %v962_v24 = vld [vmem:[%s1869_s8] sm:$0xff] (!%p445_p10)  ;;  %s1429_s15 = scalar_lea.vmem (!%p445_p10), %s1786_s18, 256  ;;  %s1433_s19 = sshll.u32 (!%p445_p10), %s1543_s28, 4  ;;  %s1434_s19 = int_to_ptr.vmem [resolvable:$false] %s1433_s19 }
  0x1e   : > { %s501_s27 = scalar_select %p500_p11, %s1531_s16, 1  ;;  %v1130_v25 = vld [vmem:[%s1873_s12] sm:$0xff] }
  0x1f   : > { %s1784_s16 = scalar_lea.hbm %s1874_s13, %s1323_s21  ;;  %p1430_p12 = scmp.ne.s32.totalorder %s1786_s18, %s1429_s15 }
  0x20   : > { %s1322_s20 = sshll.u32 %s501_s27, 4  ;;  %s1141_s27 = scalar_lea.sflag [#allocation3], %s1777_s17 }
  0x21   : > { %s507_s26 = scalar_lea.vmem %s1893_s0, %s1322_s20  ;;  %668 = vperm.xlu0 %1427, %v662_v12   ;;  %673 = vperm.xlu1 %1428, %v663_v15   ;;  %p1431_p13 = pnand %p1430_p12, %p1660_p4 }
  0x22   : > { %v512_v6 = vld [vmem:[%s507_s26 + $0x8] sm:$0x7f]  ;;  %v511_v7 = vld [vmem:[%s507_s26] sm:$0x7f]  ;;  %s1178_s26 = sshll.u32 %s498_s25, 4  ;;  %s1435_s0 = scalar_lea.vmem %s1434_s19, 512  ;;  %s1793_s26 = int_to_ptr.vmem [resolvable:$true] %s1178_s26 }
  0x23   : > { %1298 = vmatprep.subr.msk.mxu0 %vm554_vm0, %v512_v6  ;;  %v686_v8 = vrot.slane %v511_v7, 4  ;;  %v687_v9 = vrot.slane %v512_v6, 4  ;;  %p1432_p0 = pneg %p1431_p13  ;;  %p1436_p1 = scmp.lt.s32.totalorder %s1786_s18, %s1434_s19 }
  0x24   : > { %1299 = vmatpush1.msk.msra.mxu0 %vm554_vm0, %v511_v7  ;;  %p1437_p2 = scmp.lt.s32.totalorder %s1435_s0, %s1429_s15 }
  0x25   : > { %1300 = vmatmul.mubr.msk.f32.vlgmr.msra.gmra.mrb[0].mxu0 %vm541_vm1, %v513_v4  ;;  %1304 = vmatprep.subr.msk.mxu1 %vm701_vm2, %v687_v9 }
  0x26   : > { %1305 = vmatpush1.msk.msra.mxu1 %vm701_vm2, %v686_v8  ;;  %631 = vmatprep.mubr.f32.mxu0 %v1541_v0  ;;  %p1438_p3 = por %p1437_p2, %p1436_p1 }
  0x27   : > { %1306 = vmatmul.mubr.msk.f32.vlgmr.msra.gmra.mrb[0].mxu1 %vm688_vm3, %v658_v10  ;;  %678 = vperm.xlu0 %1427, %v664_v16  }
  0x28   : > { %776 = vmatprep.mubr.f32.mxu1 %v1541_v0  ;;  %683 = vperm.xlu1 %1428, %v665_v19   ;;  %p1439_p5 = pnand %p1438_p3, %p1432_p0 }
  0x29   : > { %1301 = vmatmul.mubr.msk.f32.gmra.mrb[2].mxu0 %vm541_vm1, %v514_v13 }
  0x2a   : > { %637 = vmatprep.mubr.f32.mxu0 %v1541_v0 }
  0x2b   : > { %1307 = vmatmul.mubr.msk.f32.gmra.mrb[2].mxu1 %vm688_vm3, %v659_v14  ;;  %807 = vperm.xlu0 %1427, %v804_v20  }
  0x2c   : > { %782 = vmatprep.mubr.f32.mxu1 %v1541_v0  ;;  %976 = vperm.xlu1 %1428, %v973_v23  }
  0x2d   : > { %1302 = vmatmul.mubr.msk.f32.gmra.mrb[4].mxu0 %vm541_vm1, %v515_v17 }
  0x2e   : > { %643 = vmatprep.mubr.f32.mxu0 %v1541_v0 }
  0x2f   : > { %1308 = vmatmul.mubr.msk.f32.gmra.mrb[4].mxu1 %vm688_vm3, %v660_v18  ;;  %965 = vperm.xlu0 %1427, %v962_v24  }
  0x30   : > { %788 = vmatprep.mubr.f32.mxu1 %v1541_v0  ;;  %1133 = vperm.xlu1 %1428, %v1130_v25  }
  0x31   : > { %1303 = vmatmul.mubr.msk.f32.gmra.mrb[6].mxu0 %vm541_vm1, %v516_v21 }
  0x32   : > { %878 = vmatprep.mubr.f32.mxu0 %v1541_v0 }
  0x33   : > { %1309 = vmatmul.mubr.msk.f32.gmra.mrb[6].mxu1 %vm688_vm3, %v661_v22 }
  0x34   : > { %1046 = vmatprep.mubr.f32.mxu1 %v1541_v0 }
  0x98   : > { %v524_v26 = vpop.permute.xlu0 %523  ;;  %v534_v27 = vpop.permute.xlu1 %533 }
  0x9c   : > { %v529_v28 = vpop.permute.xlu0 %528  ;;  %v539_v29 = vpop.permute.xlu1 %538 }
  0xa0   : > { %v669_v32 = vpop.permute.xlu0 %668  ;;  %v674_v41 = vpop.permute.xlu1 %673 }
  0xa6   : > { %v679_v1 = vpop.permute.xlu0 %678 }
  0xa7   : > { %v684_v8 = vpop.permute.xlu1 %683 }
  0xf8   : > { %v627_v30 = vpop.f32.mrb[0].mxu0 }
  0xf9   : > { %v629_v31 = vpop.f32.mrb[1].mxu0  ;;  %v628_v34 = vadd.f32 %v627_v30, %v524_v26  ;;  %v1053_v30 = vld [vmem:[%s1872_s11] sm:$0xff] }
  0xfa   : > { %v772_v33 = vpop.f32.mrb[0].mxu1  ;;  %v630_v37 = vadd.f32 %v629_v31, %v524_v26  ;;  %v808_v31 = vpop.permute.xlu0 %807 }
  0xfb   : > { %v773_v35 = vadd.f32 %v772_v33, %v669_v32  ;;  %v774_v36 = vpop.f32.mrb[1].mxu1  ;;  %v650_v45 = vmax.f32 %v628_v34, 0.0 }
  0xfc   : > { %v633_v38 = vpop.f32.mrb[2].mxu0  ;;  %v775_v42 = vadd.f32 %v774_v36, %v669_v32  ;;  %v651_v50 = vmax.f32 %v630_v37, 0.0 }
  0xfd   : > { %v634_v39 = vadd.f32 %v633_v38, %v529_v28  ;;  %v635_v40 = vpop.f32.mrb[3].mxu0  ;;  %v795_v46 = vmax.f32 %v773_v35, 0.0 }
  0xfe   : > { %v636_v43 = vadd.f32 %v635_v40, %v529_v28  ;;  %v778_v44 = vpop.f32.mrb[2].mxu1  ;;  %v796_v57 = vmax.f32 %v775_v42, 0.0  ;;  %v972_v28 = vld [vmem:[%s1870_s9] sm:$0xff]  ;;  %v966_v38 = vpop.permute.xlu0 %965 }
  0xff   : > { %v652_v47 = vmax.f32 %v634_v39, 0.0  ;;  %v779_v48 = vadd.f32 %v778_v44, %v674_v41  ;;  %v780_v49 = vpop.f32.mrb[3].mxu1 }
 0x100   : > { %v653_v51 = vmax.f32 %v636_v43, 0.0  ;;  %v781_v52 = vadd.f32 %v780_v49, %v674_v41  ;;  %v639_v53 = vpop.f32.mrb[4].mxu0 }
 0x101   : > { %v1327_v54 = vpack.c.bf16 %v652_v47, %v650_v45  ;;  %v797_v55 = vmax.f32 %v779_v48, 0.0  ;;  %v641_v56 = vpop.f32.mrb[5].mxu0  ;;  %v640_v62 = vadd.f32 %v639_v53, %v534_v27 }
 0x102   : > { %v1325_v58 = vpack.c.bf16 %v653_v51, %v651_v50  ;;  %v798_v59 = vmax.f32 %v781_v52, 0.0  ;;  %v784_v60 = vpop.f32.mrb[4].mxu1  ;;  %v642_v3 = vadd.f32 %v641_v56, %v534_v27  ;;  %v803_v27 = vld [vmem:[%s1866_s5] sm:$0xff] }
 0x103   : > { %v1335_v61 = vpack.c.bf16 %v797_v55, %v795_v46  ;;  %v786_v63 = vpop.f32.mrb[5].mxu1  ;;  %v785_v5 = vadd.f32 %v784_v60, %v679_v1  ;;  %v654_v12 = vmax.f32 %v640_v62, 0.0 }
 0x104   : > { %v1333_v2 = vpack.c.bf16 %v798_v59, %v796_v57  ;;  %v645_v4 = vpop.f32.mrb[6].mxu0  ;;  %1326 = vmatprep.subr.bf16.mxu0 %v1325_v58  ;;  %1342 = vmatprep.subr.bf16.mxu1 %v1325_v58  ;;  %v787_v9 = vadd.f32 %v786_v63, %v679_v1  ;;  %v655_v16 = vmax.f32 %v642_v3, 0.0 }
 0x105   : > { %v646_v6 = vadd.f32 %v645_v4, %v539_v29  ;;  %v647_v7 = vpop.f32.mrb[7].mxu0  ;;  %1328 = vmatpush1.bf16.msra.mxu0 %v1327_v54  ;;  %1344 = vmatpush1.bf16.msra.mxu1 %v1327_v54  ;;  %v799_v19 = vmax.f32 %v785_v5, 0.0 }
 0x106   : > { %v648_v10 = vadd.f32 %v647_v7, %v539_v29  ;;  %v790_v11 = vpop.f32.mrb[6].mxu1  ;;  %v800_v22 = vmax.f32 %v787_v9, 0.0  ;;  %v885_v29 = vld [vmem:[%s1868_s7] sm:$0xff] }
 0x107   : > { %v656_v13 = vmax.f32 %v646_v6, 0.0  ;;  %v791_v14 = vadd.f32 %v790_v11, %v684_v8  ;;  %v792_v15 = vpop.f32.mrb[7].mxu1 }
 0x108   : > { %v657_v17 = vmax.f32 %v648_v10, 0.0  ;;  %v793_v18 = vadd.f32 %v792_v15, %v684_v8 }
 0x109   : > { %v1331_v20 = vpack.c.bf16 %v656_v13, %v654_v12  ;;  %v801_v21 = vmax.f32 %v791_v14, 0.0 }
 0x10a   : > { %v1329_v23 = vpack.c.bf16 %v657_v17, %v655_v16  ;;  %v802_v24 = vmax.f32 %v793_v18, 0.0 }
 0x10b   : > { %v1339_v25 = vpack.c.bf16 %v801_v21, %v799_v19 }
 0x10c   : > { %v1337_v26 = vpack.c.bf16 %v802_v24, %v800_v22  ;;  %1330 = vmatprep.subr.bf16.mxu0 %v1329_v23  ;;  %1346 = vmatprep.subr.bf16.mxu1 %v1329_v23 }
 0x10d   : > { %1332 = vmatpush1.bf16.msra.mxu0 %v1331_v20  ;;  %1348 = vmatpush1.bf16.msra.mxu1 %v1331_v20 }
 0x10e   : > { %1334 = vmatprep.subr.bf16.mxu0 %v1333_v2  ;;  %1350 = vmatprep.subr.bf16.mxu1 %v1333_v2 }
 0x110   : > { %1310 = vmatmul.mubr.msk.f32.vlgmr.msra.gmra.mrb[8].mxu0 %vm810_vm4, %v803_v27  ;;  %1312 = vmatmul.mubr.msk.f32.vlgmr.msra.gmra.mrb[8].mxu1 %vm810_vm4, %v972_v28 }
 0x111   : > { %1336 = vmatpush1.bf16.msra.mxu0 %v1335_v61  ;;  %1352 = vmatpush1.bf16.msra.mxu1 %v1335_v61 }
 0x112   : > { %1338 = vmatprep.subr.bf16.mxu0 %v1337_v26  ;;  %1354 = vmatprep.subr.bf16.mxu1 %v1337_v26 }
 0x113   : > { %953 = vmatprep.mubr.f32.mxu0 %v1541_v0  ;;  %1121 = vmatprep.mubr.f32.mxu1 %v1541_v0  ;;  %v977_v0 = vpop.permute.xlu1 %976 }
 0x115   : > { %1340 = vmatpush1.bf16.msra.mxu0 %v1339_v25  ;;  %1356 = vmatpush1.bf16.msra.mxu1 %v1339_v25 }
 0x117   : > { %v1134_v39 = vpop.permute.xlu1 %1133 }
 0x118   : > { %1311 = vmatmul.mubr.msk.f32.vlgmr.msra.gmra.mrb[8].mxu0 %vm810_vm4, %v885_v29  ;;  %1313 = vmatmul.mubr.msk.f32.vlgmr.msra.gmra.mrb[8].mxu1 %vm810_vm4, %v1053_v30 }
 0x1eb   : > { %v955_v32 = vpop.f32.mrb[8].mxu0  ;;  %v1123_v33 = vpop.f32.mrb[8].mxu1 }
 0x1ec   : > { %v1357_v34 = vadd.f32 %v955_v32, %v808_v31  ;;  %v1359_v35 = vadd.f32 %v1123_v33, %v977_v0  ;;  %v957_v36 = vpop.f32.mrb[9].mxu0  ;;  %v1125_v37 = vpop.f32.mrb[9].mxu1 }
 0x1ed   : > { %v1358_v40 = vadd.f32 %v957_v36, %v808_v31  ;;  %v1360_v41 = vadd.f32 %v1125_v37, %v977_v0 }
 0x1ee   : > { %v968_v42 = vadd.f32 %v1357_v34, %v966_v38  ;;  %v1136_v43 = vadd.f32 %v1359_v35, %v1134_v39 }
 0x1ef   : > { %v969_v44 = vadd.f32 %v1358_v40, %v966_v38  ;;  %v1137_v45 = vadd.f32 %v1360_v41, %v1134_v39 }
 0x1f0   : > { %970 = vst [vmem:[%s491_s29] sm:$0xff] %v968_v42  ;;  %1138 = vst [vmem:[%s498_s25] sm:$0xff] %v1136_v43 }
 0x1f1   : > { %971 = vst [vmem:[%s491_s29 + $0x8] sm:$0xff] %v969_v44  ;;  %1139 = vst [vmem:[%s498_s25 + $0x8] sm:$0xff] %v1137_v45 }
 0x1f2   : > { %1442 = shalt.err (!%p1439_p5)
}
 0x1f3   : > { %s1443_s21 = scalar_lea.hbm %s1784_s16, 256  ;;  %s1447_s20 = scalar_lea.hbm %s1874_s13, 512 }
 0x1f4   : > { %p1444_p6 = scmp.ne.s32.totalorder %s1784_s16, %s1443_s21  ;;  %p1448_p10 = scmp.lt.u32.totalorder %s1784_s16, %s1874_s13 }
 0x1f5   : > { %p1449_p11 = scmp.lt.u32.totalorder %s1447_s20, %s1443_s21  ;;  %p1451_p13 = scmp.lt.u32.totalorder %s1443_s21, %s1784_s16 }
 0x1f6   : > { %p1445_p7 = pnand %p1444_p6, %p1660_p4 }
 0x1f7   : > { %p1450_p12 = por %p1449_p11, %p1448_p10 }
 0x1f8   : > { %p1446_p9 = pneg %p1445_p7 }
 0x1f9   : > { %p1452_p0 = por %p1451_p13, %p1450_p12 }
 0x1fb   : > { %p1453_p1 = pnand %p1452_p0, %p1446_p9 }
 0x1fd   : > { %1456 = shalt.err (!%p1453_p1)
}
 0x1fe   : > { %1365 = dma.vmem_to_hbm [thread:$0]  (%p1660_p4), %s1786_s18, 256, %s1784_s16, %s1141_s27  }
 0x1ff   : > { %s1146_s0 = scalar_lea.sflag [#allocation5], %s1777_s17  ;;  %s1457_s15 = scalar_lea.vmem %s1793_s26, 256 }
 0x200   : > { %p1458_p2 = scmp.ne.s32.totalorder %s1793_s26, %s1457_s15  ;;  %s1544_s19 = smov [#allocation4]  }
 0x201   : > { %s1461_s21 = sshll.u32 %s1544_s19, 4  ;;  %s1462_s21 = int_to_ptr.vmem [resolvable:$false] %s1461_s21 }
 0x202   : > { %p1459_p3 = pnand %p1458_p2, %p1660_p4  ;;  %s1463_s29 = scalar_lea.vmem %s1462_s21, 512 }
 0x203   : > { %p1464_p6 = scmp.lt.s32.totalorder %s1793_s26, %s1462_s21  ;;  %p1465_p7 = scmp.lt.s32.totalorder %s1463_s29, %s1457_s15 }
 0x204   : > { %p1460_p5 = pneg %p1459_p3 }
 0x205   : > { %p1466_p9 = por %p1465_p7, %p1464_p6 }
 0x207   : > { %p1467_p10 = pnand %p1466_p9, %p1460_p5 }
 0x209   : > { %1470 = shalt.err (!%p1467_p10)
}
 0x20a   : > { %s1471_s17 = scalar_lea.hbm %s1791_s24, 256  ;;  %s1475_s27 = scalar_lea.hbm %s1875_s14, 512 }
 0x20b   : > { %p1472_p11 = scmp.ne.s32.totalorder %s1791_s24, %s1471_s17  ;;  %p1476_p0 = scmp.lt.u32.totalorder %s1791_s24, %s1875_s14 }
 0x20c   : > { %p1477_p1 = scmp.lt.u32.totalorder %s1475_s27, %s1471_s17  ;;  %p1479_p3 = scmp.lt.u32.totalorder %s1471_s17, %s1791_s24 }
 0x20d   : > { %p1473_p12 = pnand %p1472_p11, %p1660_p4 }
 0x20e   : > { %p1478_p2 = por %p1477_p1, %p1476_p0 }
 0x20f   : > { %p1474_p13 = pneg %p1473_p12 }
 0x210   : > { %p1480_p5 = por %p1479_p3, %p1478_p2 }
 0x212   : > { %p1481_p6 = pnand %p1480_p5, %p1474_p13 }
 0x214   : > { %1484 = shalt.err (!%p1481_p6)
}
 0x215   : > { %1366 = dma.vmem_to_hbm [thread:$0]  (%p1660_p4), %s1793_s26, 256, %s1791_s24, %s1146_s0  }
 0x216 PF: > { %s1894_s22 = sld [smem:[#allocation11_spill]]  ;;  %s1895_s28 = sld [smem:[#allocation8_spill]] }
 0x21c   : > { %p1376_p7 = scmp.ge.s32.totalorder %s1894_s22, 2  ;;  %s1190_s19 = sand.u32 1, %s1895_s28  }
 0x21d   : > { %s1191_s21 = scalar_lea.sflag [#allocation3], %s1190_s19 }
 0x21e   : > { %p1370_p9 = pnand %p1376_p7, %p1667_p8 }
 0x220   : > { %1510 = dma.done.wait (!%p1370_p9), %s1191_s21, 256  }
 0x221   : > { %1512 = vsyncadd (!%p1370_p9), %s1191_s21, 4294967040  ;;  %s1200_s29 = scalar_lea.sflag [#allocation5], %s1190_s19 }
 0x222   : > { %1514 = dma.done.wait (!%p1370_p9), %s1200_s29, 256  }
 0x223   : > { %1516 = vsyncadd (!%p1370_p9), %s1200_s29, 4294967040  ;;  %s31_s18 = sadd.s32 1, %s1894_s22   ;;  %s1897_s23 = sld [smem:[#allocation9_spill]] }
 0x224   : > { %p28_p10 = scmp.ge.s32.totalorder %s31_s18, 4   ;;  %s1898_s15 = sld [smem:[#allocation14_spill]] }
 0x225   : > { %s1899_s16 = sld [smem:[#allocation10_spill]]  ;;  %s1900_s17 = sld [smem:[#allocation12_spill]] }
 0x226   : > { %s1901_s29 = smov %s1523_s30  ;;  %30 = sbr.rel (!%p28_p10) target bundleno = 8 (0x8), region = 124 }
 0x229   : > { %s1902_s30 = smov %s1897_s23 }
 0x22d   :  { %1205 = vsyncpa [#allocation3], 1 }
 0x22e   :  { %1207 = vsyncpa [#allocation3 + $0x1], 1 }
 0x22f   :  { %1208 = vsyncpa [#allocation5], 1 }
 0x230   :  { %1210 = vsyncpa [#allocation5 + $0x1], 1 }

</bundles_post_ra>
